<compile_context>
chip_gen: v5e
topology: v5e:2x2
jax: 0.10.0
libtpu: 0.0.40
codegen_flags: <defaults>
</compile_context>

<pallas_src>
import math

import jax
import jax.numpy as jnp
import numpy as np
from jax import lax
from jax.experimental import pallas as pl
from jax.experimental.pallas import tpu as pltpu


def _round_up(x, m):
    return (x + m - 1) // m * m


def _lora_linear_kernel(x_ref, w_ref, a_ref, b_ref, o_ref, xa_ref):
    """One (tm, tn) output tile.

    x_ref : (tm, in_f)  bf16   row tile of the flattened activations
    w_ref : (tn, in_f)  bf16   row tile of the frozen weight (UNtransposed)
    a_ref : (in_f, r)   bf16   lora_A (fully resident)
    b_ref : (r, tn)     bf16   (scale * lora_B) column tile
    o_ref : (tm, tn)    bf16
    xa_ref: (tm, r)     bf16   scratch: x @ lora_A, cached across j
    """
    j = pl.program_id(1)
    x = x_ref[...]

    # LoRA down-projection: compute once per row tile (f32 MXU accumulation),
    # store in activation dtype, reuse for every out_features tile j.
    @pl.when(j == 0)
    def _():
        xa_ref[...] = jnp.dot(
            x, a_ref[...], preferred_element_type=jnp.float32
        ).astype(xa_ref.dtype)

    # Base path: x @ W^T -- contract the last dims of both operands so the
    # weight never needs an HBM-side transpose.
    base = lax.dot_general(
        x, w_ref[...],
        dimension_numbers=(((1,), (1,)), ((), ())),
        preferred_element_type=jnp.float32)

    # LoRA up-projection (scale already folded into b_ref in the wrapper).
    lora = jnp.dot(xa_ref[...], b_ref[...],
                   preferred_element_type=jnp.float32)

    o_ref[...] = (base + lora).astype(o_ref.dtype)


def lora_linear(x, weight, lora_A, lora_B, *, scale=2.0, tm=512, tn=512):
    """Fused LoRA linear.

    x      : (..., in_f)
    weight : (out_f, in_f)   frozen base weight (PyTorch F.linear convention)
    lora_A : (in_f, r)
    lora_B : (r, out_f)
    """
    *lead, in_f = x.shape
    out_f, in_f_w = weight.shape
    assert in_f == in_f_w, "weight / activation in_features mismatch"
    r = lora_A.shape[1]

    x2d = x.reshape(-1, in_f)
    M = x2d.shape[0]

    # Tile sizes: multiples of 128 for dense MXU / lane usage, clamped to the
    # (padded) problem size so tiny shapes don't over-allocate.
    tm = max(128, min(_round_up(tm, 128), _round_up(M, 128)))
    tn = max(128, min(_round_up(tn, 128), _round_up(out_f, 128)))

    M_pad = _round_up(M, tm)
    N_pad = _round_up(out_f, tn)

    if M_pad != M:
        x2d = jnp.pad(x2d, ((0, M_pad - M), (0, 0)))
    if N_pad != out_f:
        weight = jnp.pad(weight, ((0, N_pad - out_f), (0, 0)))
        lora_B = jnp.pad(lora_B, ((0, 0), (0, N_pad - out_f)))

    # Fold the (frozen) scale into lora_B once; scale=2 is exact in bf16.
    lora_B = (lora_B.astype(jnp.float32) * scale).astype(lora_B.dtype)

    grid = (M_pad // tm, N_pad // tn)   # i outer (rows), j inner (out_f tiles)

    # Advisory cost estimate for XLA's scheduler (real, unpadded work).
    itemsize = jnp.dtype(x.dtype).itemsize
    flops = 2 * M * (in_f * out_f + in_f * r + r * out_f)
    bytes_accessed = itemsize * (M * in_f + out_f * in_f + in_f * r
                                 + r * out_f + M * out_f)
    cost = pl.CostEstimate(flops=flops, transcendentals=0,
                           bytes_accessed=bytes_accessed)

    # Explicit VMEM budget with headroom; capped at 64 MiB so the same config
    # remains valid on v7x (64 MiB physical VMEM per TensorCore).
    per_step = (tm * in_f + tn * in_f + in_f * r + r * tn + tm * tn) * itemsize
    vmem_needed = 2 * per_step + tm * r * itemsize   # double buffers + scratch
    vmem_limit = min(max(int(1.5 * vmem_needed) + (4 << 20), 32 << 20), 64 << 20)

    out2d = pl.pallas_call(
        _lora_linear_kernel,
        out_shape=jax.ShapeDtypeStruct((M_pad, N_pad), x.dtype),
        grid_spec=pltpu.PrefetchScalarGridSpec(
            num_scalar_prefetch=0,
            grid=grid,
            in_specs=[
                pl.BlockSpec((tm, in_f), lambda i, j: (i, 0)),  # x row tile (const in j)
                pl.BlockSpec((tn, in_f), lambda i, j: (j, 0)),  # W row tile (untransposed)
                pl.BlockSpec((in_f, r), lambda i, j: (0, 0)),   # lora_A (resident)
                pl.BlockSpec((r, tn), lambda i, j: (0, j)),     # scale*lora_B col tile
            ],
            out_specs=pl.BlockSpec((tm, tn), lambda i, j: (i, j)),
            scratch_shapes=[pltpu.VMEM((tm, r), x.dtype)],
        ),
        compiler_params=pltpu.CompilerParams(
            dimension_semantics=("parallel", "arbitrary"),
            vmem_limit_bytes=vmem_limit),
        cost_estimate=cost,
    )(x2d, weight, lora_A, lora_B)

    out2d = out2d[:M, :out_f]
    return out2d.reshape(*lead, out_f)


if __name__ == "__main__":
    # Small shapes consistent with the module's forward.
    batch, seq, in_features, out_features, r = 2, 8, 128, 128, 16

    key = jax.random.PRNGKey(0)
    kx, kw, ka, kb = jax.random.split(key, 4)

    x = jax.random.normal(kx, (batch, seq, in_features), dtype=jnp.bfloat16)
    # Frozen base weight (passed as `weight` in __init__): (out_features, in_features)
    weight = (jax.random.normal(kw, (out_features, in_features), dtype=jnp.float32)
              * 0.05).astype(jnp.bfloat16)
    # lora_A: kaiming_uniform_(a=sqrt(5)) -> U(-1/sqrt(fan_in), 1/sqrt(fan_in)), fan_in = r
    bound = 1.0 / math.sqrt(r)
    lora_A = jax.random.uniform(ka, (in_features, r), minval=-bound, maxval=bound,
                                dtype=jnp.float32).astype(jnp.bfloat16)
    # Module inits lora_B to zeros (LoRA path is a no-op at init); use small
    # nonzero values here so the fused LoRA path is actually exercised.
    lora_B = (jax.random.normal(kb, (r, out_features), dtype=jnp.float32)
              * 0.02).astype(jnp.bfloat16)

    out = lora_linear(x, weight, lora_A, lora_B, scale=2.0)
    out = jax.block_until_ready(out)

    # Pure-JAX reference of the PyTorch forward.
    xf = x.astype(jnp.float32)
    ref = xf @ weight.astype(jnp.float32).T
    ref = ref + 2.0 * (xf @ lora_A.astype(jnp.float32) @ lora_B.astype(jnp.float32))
    np.testing.assert_allclose(np.asarray(out, dtype=np.float32),
                               np.asarray(ref), rtol=2e-2, atol=2e-2)

    assert out.shape == (batch, seq, out_features)
    assert out.dtype == jnp.bfloat16
    print("KERNEL_OK")
</pallas_src>

<mosaic_0001>
module attributes {stable_mosaic.version = 11 : i64} {
  func.func @_lora_linear_kernel(%arg0: i32, %arg1: i32, %arg2: memref<128x128xbf16, #tpu.memory_space<vmem>>, %arg3: memref<128x128xbf16, #tpu.memory_space<vmem>>, %arg4: memref<128x16xbf16, #tpu.memory_space<vmem>>, %arg5: memref<16x128xbf16, #tpu.memory_space<vmem>>, %arg6: memref<128x128xbf16, #tpu.memory_space<vmem>>, %arg7: memref<128x16xbf16, #tpu.memory_space<vmem>>) attributes {dimension_semantics = [#tpu.dimension_semantics<parallel>, #tpu.dimension_semantics<arbitrary>], iteration_bounds = array<i64: 1, 1>, scalar_prefetch = 0 : i64, scratch_operands = 1 : i64, tpu.core_type = #tpu.core_type<tc>, window_params = [{transform_indices = @transform_0, window_bounds = array<i64: 128, 128>}, {transform_indices = @transform_1, window_bounds = array<i64: 128, 128>}, {pipeline_mode = #tpu.pipeline_mode<synchronous>, transform_indices = @transform_2, window_bounds = array<i64: 128, 16>}, {transform_indices = @transform_3, window_bounds = array<i64: 16, 128>}, {transform_indices = @transform_4, window_bounds = array<i64: 128, 128>}]} {
    %c0 = arith.constant 0 : index
    %c0_0 = arith.constant 0 : index
    %0 = vector.load %arg2[%c0, %c0_0] : memref<128x128xbf16, #tpu.memory_space<vmem>>, vector<128x128xbf16>
    %c0_i32 = arith.constant 0 : i32
    %1 = arith.cmpi eq, %arg1, %c0_i32 : i32
    %2 = arith.extui %1 : i1 to i32
    %c0_i32_1 = arith.constant 0 : i32
    %3 = arith.cmpi ne, %2, %c0_i32_1 : i32
    scf.if %3 {
      %c0_11 = arith.constant 0 : index
      %c0_12 = arith.constant 0 : index
      %12 = vector.load %arg4[%c0_11, %c0_12] : memref<128x16xbf16, #tpu.memory_space<vmem>>, vector<128x16xbf16>
      %cst_13 = arith.constant dense<0.000000e+00> : vector<128x16xf32>
      %13 = tpu.matmul %0, %12, %cst_13 {dimension_numbers = #tpu.dot_dimension_numbers<[1], [0], [0], [1], [0, 0, 1, 1], [], []>} : vector<128x128xbf16>, vector<128x16xbf16>, vector<128x16xf32> -> vector<128x16xf32>
      %14 = arith.truncf %13 : vector<128x16xf32> to vector<128x16xbf16>
      %c0_14 = arith.constant 0 : index
      %c0_15 = arith.constant 0 : index
      %15 = vector.load %arg7[%c0_14, %c0_15] : memref<128x16xbf16, #tpu.memory_space<vmem>>, vector<128x16xbf16>
      tpu.vector_store %arg7[%c0_14, %c0_15], %14 {strides = array<i32>} : memref<128x16xbf16, #tpu.memory_space<vmem>>, vector<128x16xbf16>,
    } else {
    }
    %c0_2 = arith.constant 0 : index
    %c0_3 = arith.constant 0 : index
    %4 = vector.load %arg3[%c0_2, %c0_3] : memref<128x128xbf16, #tpu.memory_space<vmem>>, vector<128x128xbf16>
    %cst = arith.constant dense<0.000000e+00> : vector<128x128xf32>
    %5 = tpu.matmul %0, %4, %cst {dimension_numbers = #tpu.dot_dimension_numbers<[1], [1], [0], [0], [0, 0, 1, 0], [], []>} : vector<128x128xbf16>, vector<128x128xbf16>, vector<128x128xf32> -> vector<128x128xf32>
    %c0_4 = arith.constant 0 : index
    %c0_5 = arith.constant 0 : index
    %6 = vector.load %arg7[%c0_4, %c0_5] : memref<128x16xbf16, #tpu.memory_space<vmem>>, vector<128x16xbf16>
    %c0_6 = arith.constant 0 : index
    %c0_7 = arith.constant 0 : index
    %7 = vector.load %arg5[%c0_6, %c0_7] : memref<16x128xbf16, #tpu.memory_space<vmem>>, vector<16x128xbf16>
    %cst_8 = arith.constant dense<0.000000e+00> : vector<128x128xf32>
    %8 = tpu.matmul %6, %7, %cst_8 {dimension_numbers = #tpu.dot_dimension_numbers<[1], [0], [0], [1], [0, 0, 1, 1], [], []>} : vector<128x16xbf16>, vector<16x128xbf16>, vector<128x128xf32> -> vector<128x128xf32>
    %9 = arith.addf %5, %8 : vector<128x128xf32>
    %10 = arith.truncf %9 : vector<128x128xf32> to vector<128x128xbf16>
    %c0_9 = arith.constant 0 : index
    %c0_10 = arith.constant 0 : index
    %11 = vector.load %arg6[%c0_9, %c0_10] : memref<128x128xbf16, #tpu.memory_space<vmem>>, vector<128x128xbf16>
    tpu.vector_store %arg6[%c0_9, %c0_10], %10 {strides = array<i32>} : memref<128x128xbf16, #tpu.memory_space<vmem>>, vector<128x128xbf16>,
    return
  }
  func.func @transform_0(%arg0: i32, %arg1: i32) -> (i32, i32) {
    %c0_i32 = arith.constant 0 : i32
    %c0_i32_0 = arith.constant 0 : i32
    return %arg0, %c0_i32 : i32, i32
  }
  func.func @transform_1(%arg0: i32, %arg1: i32) -> (i32, i32) {
    %c0_i32 = arith.constant 0 : i32
    %c0_i32_0 = arith.constant 0 : i32
    return %arg1, %c0_i32 : i32, i32
  }
  func.func @transform_2(%arg0: i32, %arg1: i32) -> (i32, i32) {
    %c0_i32 = arith.constant 0 : i32
    %c0_i32_0 = arith.constant 0 : i32
    %c0_i32_1 = arith.constant 0 : i32
    return %c0_i32, %c0_i32_0 : i32, i32
  }
  func.func @transform_3(%arg0: i32, %arg1: i32) -> (i32, i32) {
    %c0_i32 = arith.constant 0 : i32
    %c0_i32_0 = arith.constant 0 : i32
    return %c0_i32, %arg1 : i32, i32
  }
  func.func @transform_4(%arg0: i32, %arg1: i32) -> (i32, i32) {
    %c0_i32 = arith.constant 0 : i32
    return %arg0, %arg1 : i32, i32
  }
}

</mosaic_0001>

<bundles_post_ra>
// kernel: tpu_custom_call.1
= control target key start
LH: loop header
LB: loop body
LE: loop exit
PB: predicated region body
PF: predicated region fallthrough
CT: control target
= control target key end

     0   :  { %9 = vsyncpa [#allocation4], 0  ;;  %s1063_s0 = inlined_call_operand.vmem [shape: bf16[128,128], index: 0, kind: input, shape index: {}]   ;;  %s1064_s1 = inlined_call_operand.hbm [shape: bf16[128,128], index: 1, kind: input, shape index: {}]   ;;  %s1065_s2 = inlined_call_operand.vmem [shape: bf16[128,16], index: 2, kind: input, shape index: {}]   ;;  %s1066_s3 = inlined_call_operand.vmem [shape: bf16[16,128], index: 3, kind: input, shape index: {}]   ;;  %s1067_s4 = inlined_call_operand.hbm [shape: bf16[128,128], index: 4, kind: output, shape index: {}]  }
   0x1   :  { %10 = vsyncpa [#allocation5], 0  ;;  %s17_s17 = sshll.u32 %s1064_s1, 4  ;;  %s923_s18 = smov [#allocation3]   ;;  %s18_s17 = int_to_ptr.hbm [resolvable:$true] %s17_s17 }
   0x2   :  { %s19_s19 = sshll.u32 %s923_s18, 4  ;;  %s924_s20 = smov 64   ;;  %s20_s19 = int_to_ptr.vmem [resolvable:$true] %s19_s19 }
   0x3   :  { %s925_s21 = smov 4  }
   0x4   :  { %25 = dma.hbm_to_vmem [thread:$0]  %s18_s17, 1024, %s20_s19, [#allocation4], %s924_s20, %s924_s20, %s925_s21  }
   0x5   :  { %919 = dma.done.wait [#allocation4], 1024  }
   0x6   :  { %920 = vsyncadd [#allocation4], 4294966272  ;;  %v794_v0 = vld [vmem:[%s1065_s2 + $0x38] sm:$0xff]  ;;  %v793_v1 = vld [vmem:[%s1065_s2 + $0x30] sm:$0xff]  ;;  %vm232_vm0 = vcmask 125952   ;;  %vm329_vm1 = vcmask 130048  }
   0x7   :  { %167 = vmatpush.bf16.msra.mxu0 %v794_v0  ;;  %v792_v2 = vld [vmem:[%s1065_s2 + $0x28] sm:$0xff]  ;;  %v791_v3 = vld [vmem:[%s1065_s2 + $0x20] sm:$0xff]  ;;  %v790_v4 = vld [vmem:[%s1065_s2 + $0x18] sm:$0xff]  ;;  %s586_s22 = sshll.u32 %s1067_s4, 4  ;;  %s587_s22 = int_to_ptr.hbm [resolvable:$true] %s586_s22 }
   0x8   :  { %v789_v5 = vld [vmem:[%s1065_s2 + $0x10] sm:$0xff]  ;;  %v788_v6 = vld [vmem:[%s1065_s2 + $0x8] sm:$0xff]  ;;  %v787_v7 = vld [vmem:[%s1065_s2] sm:$0xff] }
   0x9   :  { %v772_v8 = vld [vmem:[%s1063_s0] sm:$0xff]  ;;  %v774_v9 = vld [vmem:[%s1063_s0 + $0x8] sm:$0xff]  ;;  %v776_v10 = vld [vmem:[%s1063_s0 + $0x10] sm:$0xff] }
   0xa   :  { %v802_v11 = vld [vmem:[#allocation3 + $0x38] sm:$0xff]  ;;  %v801_v13 = vld [vmem:[#allocation3 + $0x30] sm:$0xff]  ;;  %v800_v14 = vld [vmem:[#allocation3 + $0x28] sm:$0xff] }
   0xb   :  { %168 = vmatpush.bf16.msra.mxu0 %v793_v1  ;;  %499 = vmatpush.bf16.xpose.msra.mxu2 %v802_v11  ;;  %v778_v12 = vld [vmem:[%s1063_s0 + $0x18] sm:$0xff]  ;;  %v780_v15 = vld [vmem:[%s1063_s0 + $0x20] sm:$0xff]  ;;  %v782_v18 = vld [vmem:[%s1063_s0 + $0x28] sm:$0xff] }
   0xc   :  { %859 = vmatpush.bf16.xpose.msra.mxu3 %v802_v11  ;;  %v799_v16 = vld [vmem:[#allocation3 + $0x20] sm:$0xff]  ;;  %v798_v17 = vld [vmem:[#allocation3 + $0x18] sm:$0xff]  ;;  %v797_v19 = vld [vmem:[#allocation3 + $0x10] sm:$0xff] }
   0xd   :  { %v796_v20 = vld [vmem:[#allocation3 + $0x8] sm:$0xff]  ;;  %v784_v21 = vld [vmem:[%s1063_s0 + $0x30] sm:$0xff]  ;;  %v795_v22 = vld [vmem:[#allocation3] sm:$0xff] }
   0xe   :  { %v771_v23 = vld [vmem:[%s1063_s0] sm:$0xff]  ;;  %v786_v24 = vld [vmem:[%s1063_s0 + $0x38] sm:$0xff]  ;;  %v773_v26 = vld [vmem:[%s1063_s0 + $0x8] sm:$0xff] }
   0xf   :  { %169 = vmatpush.bf16.msra.mxu0 %v792_v2  ;;  %v811_v25 = vld [vmem:[%s1066_s3] sm:$0xff]  ;;  %v775_v31 = vld [vmem:[%s1063_s0 + $0x10] sm:$0xff]  ;;  %v777_v37 = vld [vmem:[%s1063_s0 + $0x18] sm:$0xff] }
  0x10   :  { %361 = vmatpush.bf16.msra.mxu1 %v811_v25  ;;  %v779_v43 = vld [vmem:[%s1063_s0 + $0x20] sm:$0xff]  ;;  %v781_v47 = vld [vmem:[%s1063_s0 + $0x28] sm:$0xff]  ;;  %v783_v53 = vld [vmem:[%s1063_s0 + $0x30] sm:$0xff] }
  0x11   :  { %v785_v59 = vld [vmem:[%s1063_s0 + $0x38] sm:$0xff]  ;;  %s926_s0 = smov [#allocation6]  }
  0x12   :  { %s584_s17 = sshll.u32 %s926_s0, 4  ;;  %s585_s17 = int_to_ptr.vmem [resolvable:$true] %s584_s17 }
  0x13   :  { %170 = vmatpush.bf16.msra.mxu0 %v791_v3  ;;  %500 = vmatpush.bf16.xpose.msra.mxu2 %v801_v13 }
  0x14   :  { %860 = vmatpush.bf16.xpose.msra.mxu3 %v801_v13 }
  0x17   :  { %171 = vmatpush.bf16.msra.mxu0 %v790_v4 }
  0x1b   :  { %172 = vmatpush.bf16.msra.mxu0 %v789_v5  ;;  %501 = vmatpush.bf16.xpose.msra.mxu2 %v800_v14 }
  0x1c   :  { %861 = vmatpush.bf16.xpose.msra.mxu3 %v800_v14 }
  0x1f   :  { %173 = vmatpush.bf16.msra.mxu0 %v788_v6 }
  0x23   :  { %174 = vmatpush.bf16.msra.mxu0 %v787_v7  ;;  %502 = vmatpush.bf16.xpose.msra.mxu2 %v799_v16 }
  0x24   :  { %862 = vmatpush.bf16.xpose.msra.mxu3 %v799_v16 }
  0x26   :  { %175 = vmatmul.bf16.vlgmr.msra.gmra.mxu0 %v772_v8 }
  0x2b   :  { %503 = vmatpush.bf16.xpose.msra.mxu2 %v798_v17 }
  0x2c   :  { %863 = vmatpush.bf16.xpose.msra.mxu3 %v798_v17 }
  0x33   :  { %504 = vmatpush.bf16.xpose.msra.mxu2 %v797_v19 }
  0x34   :  { %864 = vmatpush.bf16.xpose.msra.mxu3 %v797_v19 }
  0x36   :  { %180 = vmatmul.bf16.gmra.mxu0 %v774_v9 }
  0x3b   :  { %505 = vmatpush.bf16.xpose.msra.mxu2 %v796_v20 }
  0x3c   :  { %865 = vmatpush.bf16.xpose.msra.mxu3 %v796_v20 }
  0x43   :  { %506 = vmatpush.bf16.xpose.msra.mxu2 %v795_v22 }
  0x44   :  { %866 = vmatpush.bf16.xpose.msra.mxu3 %v795_v22 }
  0x46   :  { %185 = vmatmul.bf16.gmra.mxu0 %v776_v10 }
  0x4a   :  { %507 = vmatmul.bf16.vlgmr.msra.gmra.mxu2 %v771_v23 }
  0x4b   :  { %532 = vmatmul.bf16.vlgmr.msra.gmra.mxu3 %v781_v47 }
  0x56   :  { %190 = vmatmul.bf16.gmra.mxu0 %v778_v12 }
  0x5a   :  { %512 = vmatmul.bf16.gmra.mxu2 %v773_v26 }
  0x5b   :  { %537 = vmatmul.bf16.gmra.mxu3 %v783_v53 }
  0x66   :  { %195 = vmatmul.bf16.gmra.mxu0 %v780_v15 }
  0x6a   :  { %517 = vmatmul.bf16.gmra.mxu2 %v775_v31 }
  0x6b   :  { %542 = vmatmul.bf16.gmra.mxu3 %v785_v59 }
  0x76   :  { %200 = vmatmul.bf16.gmra.mxu0 %v782_v18 }
  0x7a   :  { %522 = vmatmul.bf16.gmra.mxu2 %v777_v37 }
  0x86   :  { %205 = vmatmul.bf16.gmra.mxu0 %v784_v21 }
  0x8a   :  { %527 = vmatmul.bf16.gmra.mxu2 %v779_v43 }
  0x96   :  { %210 = vmatmul.bf16.gmra.mxu0 %v786_v24 }
  0xa3   :  { %v176_v27 = vpop.f32.mrf.mxu0 }
  0xa4   :  { %v216_v28 = vpack.c.bf16 %v176_v27, %v176_v27 }
  0xa6   :  { %233 = vst.msk [vmem:[#allocation2] sm:$0xf] %vm232_vm0, %v216_v28 }
  0xab   :  { %v178_v29 = vpop.f32.mrf.mxu0 }
  0xac   :  { %v217_v30 = vpack.c.bf16 %v178_v29, %v178_v29 }
  0xae   :  { %234 = vst.msk [vmem:[#allocation2 + $0x4] sm:$0xf] %vm232_vm0, %v217_v30 }
  0xb3   :  { %v181_v32 = vpop.f32.mrf.mxu0 }
  0xb4   :  { %v218_v33 = vpack.c.bf16 %v181_v32, %v181_v32 }
  0xb5   :  { %v803_v34 = vld [vmem:[#allocation2] sm:$0xff] }
  0xb6   :  { %235 = vst.msk [vmem:[#allocation2 + $0x8] sm:$0xf] %vm232_vm0, %v218_v33  ;;  %699 = vmatmul.msk.bf16.vlgmr.msra.gmra.mxu1 %vm329_vm1, %v803_v34 }
  0xbb   :  { %v183_v35 = vpop.f32.mrf.mxu0 }
  0xbc   :  { %v219_v36 = vpack.c.bf16 %v183_v35, %v183_v35 }
  0xbe   :  { %236 = vst.msk [vmem:[#allocation2 + $0xc] sm:$0xf] %vm232_vm0, %v219_v36 }
  0xc3   :  { %v186_v38 = vpop.f32.mrf.mxu0 }
  0xc4   :  { %v220_v39 = vpack.c.bf16 %v186_v38, %v186_v38 }
  0xc5   :  { %v804_v40 = vld [vmem:[#allocation2 + $0x8] sm:$0xff] }
  0xc6   :  { %237 = vst.msk [vmem:[#allocation2 + $0x10] sm:$0xf] %vm232_vm0, %v220_v39  ;;  %700 = vmatmul.msk.bf16.gmra.mxu1 %vm329_vm1, %v804_v40 }
  0xcb   :  { %v188_v41 = vpop.f32.mrf.mxu0 }
  0xcc   :  { %v221_v42 = vpack.c.bf16 %v188_v41, %v188_v41 }
  0xcd   :  { %v508_v8 = vpop.f32.mrf.mxu2 }
  0xce   :  { %238 = vst.msk [vmem:[#allocation2 + $0x14] sm:$0xf] %vm232_vm0, %v221_v42  ;;  %v533_v40 = vpop.f32.mrf.mxu3 }
  0xd3   :  { %v191_v44 = vpop.f32.mrf.mxu0 }
  0xd4   :  { %v222_v45 = vpack.c.bf16 %v191_v44, %v191_v44 }
  0xd5   :  { %v805_v46 = vld [vmem:[#allocation2 + $0x10] sm:$0xff]  ;;  %v510_v10 = vpop.f32.mrf.mxu2 }
  0xd6   :  { %239 = vst.msk [vmem:[#allocation2 + $0x18] sm:$0xf] %vm232_vm0, %v222_v45  ;;  %701 = vmatmul.msk.bf16.gmra.mxu1 %vm329_vm1, %v805_v46  ;;  %v535_v46 = vpop.f32.mrf.mxu3 }
  0xdb   :  { %v193_v48 = vpop.f32.mrf.mxu0 }
  0xdc   :  { %v223_v49 = vpack.c.bf16 %v193_v48, %v193_v48 }
  0xdd   :  { %v513_v12 = vpop.f32.mrf.mxu2 }
  0xde   :  { %240 = vst.msk [vmem:[#allocation2 + $0x1c] sm:$0xf] %vm232_vm0, %v223_v49 }
  0xe3   :  { %v196_v50 = vpop.f32.mrf.mxu0 }
  0xe4   :  { %v224_v51 = vpack.c.bf16 %v196_v50, %v196_v50  ;;  %v538_v50 = vpop.f32.mrf.mxu3 }
  0xe5   :  { %v806_v52 = vld [vmem:[#allocation2 + $0x18] sm:$0xff]  ;;  %v515_v16 = vpop.f32.mrf.mxu2 }
  0xe6   :  { %241 = vst.msk [vmem:[#allocation2 + $0x20] sm:$0xf] %vm232_vm0, %v224_v51  ;;  %702 = vmatmul.msk.bf16.gmra.mxu1 %vm329_vm1, %v806_v52 }
  0xeb   :  { %v198_v54 = vpop.f32.mrf.mxu0 }
  0xec   :  { %v225_v55 = vpack.c.bf16 %v198_v54, %v198_v54  ;;  %v540_v53 = vpop.f32.mrf.mxu3 }
  0xed   :  { %v518_v19 = vpop.f32.mrf.mxu2 }
  0xee   :  { %242 = vst.msk [vmem:[#allocation2 + $0x24] sm:$0xf] %vm232_vm0, %v225_v55 }
  0xf3   :  { %v201_v56 = vpop.f32.mrf.mxu0 }
  0xf4   :  { %v226_v57 = vpack.c.bf16 %v201_v56, %v201_v56 }
  0xf5   :  { %v807_v58 = vld [vmem:[#allocation2 + $0x20] sm:$0xff]  ;;  %v520_v24 = vpop.f32.mrf.mxu2 }
  0xf6   :  { %243 = vst.msk [vmem:[#allocation2 + $0x28] sm:$0xf] %vm232_vm0, %v226_v57  ;;  %703 = vmatmul.msk.bf16.gmra.mxu1 %vm329_vm1, %v807_v58  ;;  %v543_v58 = vpop.f32.mrf.mxu3 }
  0xfb   :  { %v203_v60 = vpop.f32.mrf.mxu0 }
  0xfc   :  { %v227_v61 = vpack.c.bf16 %v203_v60, %v203_v60 }
  0xfd   :  { %v523_v27 = vpop.f32.mrf.mxu2 }
  0xfe   :  { %244 = vst.msk [vmem:[#allocation2 + $0x2c] sm:$0xf] %vm232_vm0, %v227_v61  ;;  %v545_v60 = vpop.f32.mrf.mxu3 }
 0x103   :  { %v206_v62 = vpop.f32.mrf.mxu0 }
 0x104   :  { %v228_v63 = vpack.c.bf16 %v206_v62, %v206_v62 }
 0x105   :  { %v808_v0 = vld [vmem:[#allocation2 + $0x28] sm:$0xff]  ;;  %v525_v32 = vpop.f32.mrf.mxu2 }
 0x106   :  { %245 = vst.msk [vmem:[#allocation2 + $0x30] sm:$0xf] %vm232_vm0, %v228_v63  ;;  %704 = vmatmul.msk.bf16.gmra.mxu1 %vm329_vm1, %v808_v0 }
 0x10b   :  { %v208_v1 = vpop.f32.mrf.mxu0 }
 0x10c   :  { %v229_v2 = vpack.c.bf16 %v208_v1, %v208_v1 }
 0x10d   :  { %v528_v37 = vpop.f32.mrf.mxu2 }
 0x10e   :  { %246 = vst.msk [vmem:[#allocation2 + $0x34] sm:$0xf] %vm232_vm0, %v229_v2 }
 0x113   :  { %v211_v3 = vpop.f32.mrf.mxu0 }
 0x114   :  { %v230_v4 = vpack.c.bf16 %v211_v3, %v211_v3 }
 0x115   :  { %v809_v5 = vld [vmem:[#allocation2 + $0x30] sm:$0xff]  ;;  %v530_v39 = vpop.f32.mrf.mxu2 }
 0x116   :  { %247 = vst.msk [vmem:[#allocation2 + $0x38] sm:$0xf] %vm232_vm0, %v230_v4  ;;  %705 = vmatmul.msk.bf16.gmra.mxu1 %vm329_vm1, %v809_v5 }
 0x11b   :  { %v213_v6 = vpop.f32.mrf.mxu0 }
 0x11c   :  { %v231_v7 = vpack.c.bf16 %v213_v6, %v213_v6 }
 0x11e   :  { %248 = vst.msk [vmem:[#allocation2 + $0x3c] sm:$0xf] %vm232_vm0, %v231_v7 }
 0x125   :  { %v810_v9 = vld [vmem:[#allocation2 + $0x38] sm:$0xff] }
 0x126   :  { %706 = vmatmul.msk.bf16.gmra.mxu1 %vm329_vm1, %v810_v9 }
 0x133   :  { %v363_v11 = vpop.f32.mrf.mxu1 }
 0x134   :  { %v509_v14 = vadd.f32 %v508_v8, %v363_v11 }
 0x13b   :  { %v365_v13 = vpop.f32.mrf.mxu1 }
 0x13c   :  { %v511_v15 = vadd.f32 %v510_v10, %v365_v13 }
 0x13e   :  { %v815_v17 = vpack.c.bf16 %v511_v15, %v509_v14 }
 0x140   :  { %816 = vst [vmem:[#allocation6] sm:$0xff] %v815_v17  }
 0x143   :  { %v368_v18 = vpop.f32.mrf.mxu1 }
 0x144   :  { %v514_v21 = vadd.f32 %v513_v12, %v368_v18 }
 0x14b   :  { %v370_v20 = vpop.f32.mrf.mxu1 }
 0x14c   :  { %v516_v22 = vadd.f32 %v515_v16, %v370_v20 }
 0x14e   :  { %v820_v23 = vpack.c.bf16 %v516_v22, %v514_v21 }
 0x150   :  { %852 = vst [vmem:[#allocation6 + $0x8] sm:$0xff] %v820_v23  }
 0x153   :  { %v373_v25 = vpop.f32.mrf.mxu1 }
 0x154   :  { %v519_v28 = vadd.f32 %v518_v19, %v373_v25 }
 0x15b   :  { %v375_v26 = vpop.f32.mrf.mxu1 }
 0x15c   :  { %v521_v29 = vadd.f32 %v520_v24, %v375_v26 }
 0x15e   :  { %v825_v30 = vpack.c.bf16 %v521_v29, %v519_v28 }
 0x160   :  { %853 = vst [vmem:[#allocation6 + $0x10] sm:$0xff] %v825_v30  }
 0x163   :  { %v378_v31 = vpop.f32.mrf.mxu1 }
 0x164   :  { %v524_v34 = vadd.f32 %v523_v27, %v378_v31 }
 0x16b   :  { %v380_v33 = vpop.f32.mrf.mxu1 }
 0x16c   :  { %v526_v35 = vadd.f32 %v525_v32, %v380_v33 }
 0x16e   :  { %v830_v36 = vpack.c.bf16 %v526_v35, %v524_v34 }
 0x170   :  { %854 = vst [vmem:[#allocation6 + $0x18] sm:$0xff] %v830_v36  }
 0x173   :  { %v383_v38 = vpop.f32.mrf.mxu1 }
 0x174   :  { %v529_v42 = vadd.f32 %v528_v37, %v383_v38 }
 0x17b   :  { %v385_v41 = vpop.f32.mrf.mxu1 }
 0x17c   :  { %v531_v43 = vadd.f32 %v530_v39, %v385_v41 }
 0x17e   :  { %v835_v44 = vpack.c.bf16 %v531_v43, %v529_v42 }
 0x180   :  { %855 = vst [vmem:[#allocation6 + $0x20] sm:$0xff] %v835_v44  }
 0x183   :  { %v388_v45 = vpop.f32.mrf.mxu1 }
 0x184   :  { %v534_v48 = vadd.f32 %v533_v40, %v388_v45 }
 0x18b   :  { %v390_v47 = vpop.f32.mrf.mxu1 }
 0x18c   :  { %v536_v49 = vadd.f32 %v535_v46, %v390_v47 }
 0x18e   :  { %v840_v51 = vpack.c.bf16 %v536_v49, %v534_v48 }
 0x190   :  { %856 = vst [vmem:[#allocation6 + $0x28] sm:$0xff] %v840_v51  }
 0x193   :  { %v393_v52 = vpop.f32.mrf.mxu1 }
 0x194   :  { %v539_v55 = vadd.f32 %v538_v50, %v393_v52 }
 0x19b   :  { %v395_v54 = vpop.f32.mrf.mxu1 }
 0x19c   :  { %v541_v56 = vadd.f32 %v540_v53, %v395_v54 }
 0x19e   :  { %v845_v57 = vpack.c.bf16 %v541_v56, %v539_v55 }
 0x1a0   :  { %857 = vst [vmem:[#allocation6 + $0x30] sm:$0xff] %v845_v57  }
 0x1a3   :  { %v398_v59 = vpop.f32.mrf.mxu1 }
 0x1a4   :  { %v544_v62 = vadd.f32 %v543_v58, %v398_v59 }
 0x1ab   :  { %v400_v61 = vpop.f32.mrf.mxu1 }
 0x1ac   :  { %v546_v63 = vadd.f32 %v545_v60, %v400_v61 }
 0x1ae   :  { %v850_v0 = vpack.c.bf16 %v546_v63, %v544_v62 }
 0x1b0   :  { %858 = vst [vmem:[#allocation6 + $0x38] sm:$0xff] %v850_v0  }
 0x1b1   :  { %592 = dma.vmem_to_hbm [thread:$0]  %s585_s17, 1024, %s587_s22, [#allocation5], %s924_s20, %s924_s20, %s925_s21  }
 0x1b2   :  { %921 = dma.done.wait [#allocation5], 1024  }
 0x1b3   :  { %922 = vsyncadd [#allocation5], 4294966272 }
 0x1b4   :  { %597 = vsyncpa [#allocation4], 1 }
 0x1b5   :  { %598 = vsyncpa [#allocation5], 1 }

</bundles_post_ra>
